<compile_context>
chip_gen: v6e
topology: v6e:2x2x1
jax: 0.10.0
libtpu: 0.0.40
codegen_flags: <defaults>
</compile_context>

<pallas_src>
import jax
import jax.numpy as jnp
from jax.experimental import pallas as pl
from jax.experimental.pallas import tpu as pltpu

LANE = 128
# Double-buffered (x + out) tiles cost ~128 * tile_b bytes of VMEM (the 3- and
# 1-row blocks pad to 8 sublanes).  65536 lanes ~= 8 MiB: inside v5e's 16 MiB
# default scoped VMEM and well inside v6e/v7x's 32 MiB scoped budget, so the
# same cap is safe on every generation without raising vmem_limit_bytes.
MAX_TILE_B = 65536


def mlp_kernel(x_ref, w1_ref, b1_ref, w2_ref, b2_ref, w3t_ref, b3_ref, o_ref):
    # x_ref:  [3,  TB]   (feature-major batch tile; TB lanes)
    # w1_ref: [16, 3]    b1_ref: [16, 1]
    # w2_ref: [32, 16]   b2_ref: [32, 1]
    # w3t_ref:[32, 1]    b3_ref: [1, 1]
    # o_ref:  [1,  TB]
    x = x_ref[...]
    w1 = w1_ref[...]

    # --- layer 1 (in=3, out=16): VPU broadcast-FMA, unrolled over K=3.
    # A K=3 contraction wastes an MXU pass; outer-product broadcasts keep it on
    # the VALU slots with the batch on the lane axis.
    h1 = b1_ref[...] + w1[:, 0:1] * x[0:1, :]
    h1 = h1 + w1[:, 1:2] * x[1:2, :]
    h1 = h1 + w1[:, 2:3] * x[2:3, :]
    h1 = jnp.maximum(h1, 0.0)                                     # ReLU -> [16, TB]

    # --- layer 2 (in=16, out=32): keep on the MXU, f32 accumulation.
    h2 = jnp.dot(w2_ref[...], h1, preferred_element_type=jnp.float32) + b2_ref[...]
    h2 = jnp.maximum(h2, 0.0)                                     # ReLU -> [32, TB]

    # --- layer 3 (in=32, out=1): VPU mul + XLU sublane reduce (no MXU push
    # for an N=1 result).
    out = jnp.sum(w3t_ref[...] * h2, axis=0, keepdims=True) + b3_ref[...]   # [1, TB]

    o_ref[...] = out.astype(o_ref.dtype)                          # lane-dense store


def _choose_tile_b(batch, max_tile_b=MAX_TILE_B):
    """Aim for ~8 grid steps (keeps the pipeline warm and lets v7x's two
    TensorCores share the 'parallel' batch axis), lane-align, cap for VMEM."""
    tile = -(-batch // 8)               # cdiv(batch, 8)
    tile = -(-tile // LANE) * LANE      # round up to a lane multiple
    return max(LANE, min(tile, max_tile_b))


def neuronet_forward_fm(x_fm, params, *, tile_b=None):
    """Fused NeuroNet forward.

    x_fm: [3, B] float32, FEATURE-MAJOR (batch on the fast/lane axis).  Produce
    this layout upstream; no pad or transpose copy happens here.  The final
    partial batch tile (B not a multiple of tile_b) is handled by Pallas'
    boundary masking: out-of-bounds lanes read garbage and their stores are
    dropped, and every op in the kernel is per-lane so no valid lane is
    contaminated.

    Returns the fc3 output as [B, 1].
    """
    w1, b1, w2, b2, w3, b3 = params
    _, B = x_fm.shape

    if tile_b is None:
        tile_b = _choose_tile_b(B)
    if tile_b % LANE != 0:
        raise ValueError(f"tile_b must be a multiple of {LANE}, got {tile_b}")
    grid_b = pl.cdiv(B, tile_b)

    # Free contiguous reshapes (metadata only): biases to columns, w3 (1,32) to
    # a (32,1) column so layer 3 is a sublane reduce.
    b1c = b1.reshape(16, 1)
    b2c = b2.reshape(32, 1)
    w3c = w3.reshape(32, 1)
    b3c = b3.reshape(1, 1)

    out = pl.pallas_call(
        mlp_kernel,
        out_shape=jax.ShapeDtypeStruct((1, B), jnp.float32),
        grid_spec=pltpu.PrefetchScalarGridSpec(
            num_scalar_prefetch=0,
            grid=(grid_b,),
            in_specs=[
                # x streams with the batch grid (double-buffered DMA).
                pl.BlockSpec((3, tile_b), lambda i: (0, i)),
                # Tiny weights/biases: constant index_map -> fetched once,
                # VMEM-resident across all batch tiles.
                pl.BlockSpec((16, 3), lambda i: (0, 0)),
                pl.BlockSpec((16, 1), lambda i: (0, 0)),
                pl.BlockSpec((32, 16), lambda i: (0, 0)),
                pl.BlockSpec((32, 1), lambda i: (0, 0)),
                pl.BlockSpec((32, 1), lambda i: (0, 0)),
                pl.BlockSpec((1, 1), lambda i: (0, 0)),
            ],
            out_specs=pl.BlockSpec((1, tile_b), lambda i: (0, i)),
        ),
        compiler_params=pltpu.CompilerParams(
            # Batch tiles are independent: shard across megacore / v7x 2-TC.
            dimension_semantics=("parallel",),
        ),
    )(x_fm, w1, b1c, w2, b2c, w3c, b3c)

    # [1, B] -> [B, 1] is a contiguous reshape (metadata only, no HBM copy).
    return out.reshape(B, 1)


def neuronet_forward(x, params, *, tile_b=None):
    """PyTorch-layout convenience entry point (x: [B, 3]).

    The transpose to feature-major is a layout shim that costs one extra HBM
    copy of x; prefer producing [3, B] upstream and calling
    `neuronet_forward_fm` directly on hot paths.
    """
    return neuronet_forward_fm(x.T, params, tile_b=tile_b)


def init_params(key):
    """Deterministic init mimicking nn.Linear default (U[-1/sqrt(fan_in), +]).

    Shapes match PyTorch exactly: weights [out, in], biases [out]."""
    dims = [(3, 16), (16, 32), (32, 1)]
    params = []
    for fan_in, fan_out in dims:
        kw, kb, key = jax.random.split(key, 3)
        bound = 1.0 / jnp.sqrt(fan_in)
        w = jax.random.uniform(kw, (fan_out, fan_in), jnp.float32, -bound, bound)
        b = jax.random.uniform(kb, (fan_out,), jnp.float32, -bound, bound)
        params.extend([w, b])
    return tuple(params)


if __name__ == "__main__":
    key = jax.random.PRNGKey(0)
    k_x, k_p = jax.random.split(key)

    # Small batch that is NOT a multiple of 128: exercises the masked final
    # tile and a multi-step (grid=3 at tile_b=128) pipelined batch loop.
    B = 300
    x = jax.random.normal(k_x, (B, 3), jnp.float32)   # PyTorch [B, in] layout
    params = init_params(k_p)

    # Feature-major [3, B] slab: in production this layout comes straight from
    # the producer (zero extra copies); here we transpose once in the driver.
    x_fm = x.T

    fwd = jax.jit(neuronet_forward_fm)
    out = fwd(x_fm, params)
    jax.block_until_ready(out)

    # Cross-check against a plain-JAX reference of the same math.
    w1, b1, w2, b2, w3, b3 = params
    ref = jnp.maximum(x @ w1.T + b1, 0.0)
    ref = jnp.maximum(ref @ w2.T + b2, 0.0)
    ref = ref @ w3.T + b3
    assert out.shape == (B, 1)
    assert jnp.allclose(out, ref, atol=1e-5, rtol=1e-5), float(
        jnp.max(jnp.abs(out - ref)))

    print("KERNEL_OK")
</pallas_src>

<mosaic_0001>
module attributes {stable_mosaic.version = 11 : i64} {
  func.func @mlp_kernel(%arg0: i32, %arg1: memref<3x128xf32, #tpu.memory_space<vmem>>, %arg2: memref<16x3xf32, #tpu.memory_space<vmem>>, %arg3: memref<16x1xf32, #tpu.memory_space<vmem>>, %arg4: memref<32x16xf32, #tpu.memory_space<vmem>>, %arg5: memref<32x1xf32, #tpu.memory_space<vmem>>, %arg6: memref<32x1xf32, #tpu.memory_space<vmem>>, %arg7: memref<1x1xf32, #tpu.memory_space<vmem>>, %arg8: memref<1x128xf32, #tpu.memory_space<vmem>>) attributes {dimension_semantics = [#tpu.dimension_semantics<parallel>], iteration_bounds = array<i64: 3>, scalar_prefetch = 0 : i64, scratch_operands = 0 : i64, tpu.core_type = #tpu.core_type<tc>, window_params = [{transform_indices = @transform_0, window_bounds = array<i64: 3, 128>}, {pipeline_mode = #tpu.pipeline_mode<synchronous>, transform_indices = @transform_1, window_bounds = array<i64: 16, 3>}, {pipeline_mode = #tpu.pipeline_mode<synchronous>, transform_indices = @transform_2, window_bounds = array<i64: 16, 1>}, {pipeline_mode = #tpu.pipeline_mode<synchronous>, transform_indices = @transform_3, window_bounds = array<i64: 32, 16>}, {pipeline_mode = #tpu.pipeline_mode<synchronous>, transform_indices = @transform_4, window_bounds = array<i64: 32, 1>}, {pipeline_mode = #tpu.pipeline_mode<synchronous>, transform_indices = @transform_5, window_bounds = array<i64: 32, 1>}, {pipeline_mode = #tpu.pipeline_mode<synchronous>, transform_indices = @transform_6, window_bounds = array<i64: 1, 1>}, {transform_indices = @transform_7, window_bounds = array<i64: 1, 128>}]} {
    %c0 = arith.constant 0 : index
    %c0_0 = arith.constant 0 : index
    %0 = vector.load %arg1[%c0, %c0_0] : memref<3x128xf32, #tpu.memory_space<vmem>>, vector<3x128xf32>
    %c0_1 = arith.constant 0 : index
    %c0_2 = arith.constant 0 : index
    %1 = vector.load %arg2[%c0_1, %c0_2] : memref<16x3xf32, #tpu.memory_space<vmem>>, vector<16x3xf32>
    %c0_3 = arith.constant 0 : index
    %c0_4 = arith.constant 0 : index
    %2 = vector.load %arg3[%c0_3, %c0_4] : memref<16x1xf32, #tpu.memory_space<vmem>>, vector<16x1xf32>
    %3 = vector.extract_strided_slice %1 {offsets = [0, 0], sizes = [16, 1], strides = [1, 1]} : vector<16x3xf32> to vector<16x1xf32>
    %4 = vector.extract_strided_slice %0 {offsets = [0, 0], sizes = [1, 128], strides = [1, 1]} : vector<3x128xf32> to vector<1x128xf32>
    %5 = vector.broadcast %3 : vector<16x1xf32> to vector<16x128xf32>
    %6 = vector.broadcast %4 : vector<1x128xf32> to vector<16x128xf32>
    %7 = arith.mulf %5, %6 : vector<16x128xf32>
    %8 = vector.broadcast %2 : vector<16x1xf32> to vector<16x128xf32>
    %9 = arith.addf %8, %7 : vector<16x128xf32>
    %10 = vector.extract_strided_slice %1 {offsets = [0, 1], sizes = [16, 1], strides = [1, 1]} : vector<16x3xf32> to vector<16x1xf32>
    %11 = vector.extract_strided_slice %0 {offsets = [1, 0], sizes = [1, 128], strides = [1, 1]} : vector<3x128xf32> to vector<1x128xf32>
    %12 = vector.broadcast %10 : vector<16x1xf32> to vector<16x128xf32>
    %13 = vector.broadcast %11 : vector<1x128xf32> to vector<16x128xf32>
    %14 = arith.mulf %12, %13 : vector<16x128xf32>
    %15 = arith.addf %9, %14 : vector<16x128xf32>
    %16 = vector.extract_strided_slice %1 {offsets = [0, 2], sizes = [16, 1], strides = [1, 1]} : vector<16x3xf32> to vector<16x1xf32>
    %17 = vector.extract_strided_slice %0 {offsets = [2, 0], sizes = [1, 128], strides = [1, 1]} : vector<3x128xf32> to vector<1x128xf32>
    %18 = vector.broadcast %16 : vector<16x1xf32> to vector<16x128xf32>
    %19 = vector.broadcast %17 : vector<1x128xf32> to vector<16x128xf32>
    %20 = arith.mulf %18, %19 : vector<16x128xf32>
    %21 = arith.addf %15, %20 : vector<16x128xf32>
    %cst = arith.constant 0.000000e+00 : f32
    %22 = vector.broadcast %cst : f32 to vector<16x128xf32>
    %23 = arith.maximumf %21, %22 : vector<16x128xf32>
    %c0_5 = arith.constant 0 : index
    %c0_6 = arith.constant 0 : index
    %24 = vector.load %arg4[%c0_5, %c0_6] : memref<32x16xf32, #tpu.memory_space<vmem>>, vector<32x16xf32>
    %cst_7 = arith.constant dense<0.000000e+00> : vector<32x128xf32>
    %25 = tpu.matmul %24, %23, %cst_7 {dimension_numbers = #tpu.dot_dimension_numbers<[1], [0], [0], [1], [0, 0, 1, 1], [], []>} : vector<32x16xf32>, vector<16x128xf32>, vector<32x128xf32> -> vector<32x128xf32>
    %c0_8 = arith.constant 0 : index
    %c0_9 = arith.constant 0 : index
    %26 = vector.load %arg5[%c0_8, %c0_9] : memref<32x1xf32, #tpu.memory_space<vmem>>, vector<32x1xf32>
    %27 = vector.broadcast %26 : vector<32x1xf32> to vector<32x128xf32>
    %28 = arith.addf %25, %27 : vector<32x128xf32>
    %cst_10 = arith.constant 0.000000e+00 : f32
    %29 = vector.broadcast %cst_10 : f32 to vector<32x128xf32>
    %30 = arith.maximumf %28, %29 : vector<32x128xf32>
    %c0_11 = arith.constant 0 : index
    %c0_12 = arith.constant 0 : index
    %31 = vector.load %arg6[%c0_11, %c0_12] : memref<32x1xf32, #tpu.memory_space<vmem>>, vector<32x1xf32>
    %32 = vector.broadcast %31 : vector<32x1xf32> to vector<32x128xf32>
    %33 = arith.mulf %32, %30 : vector<32x128xf32>
    %cst_13 = arith.constant dense<0.000000e+00> : vector<128xf32>
    %34 = vector.multi_reduction <add>, %33, %cst_13 [0] : vector<32x128xf32> to vector<128xf32>
    %35 = vector.shape_cast %34 : vector<128xf32> to vector<1x128xf32>
    %c0_14 = arith.constant 0 : index
    %c0_15 = arith.constant 0 : index
    %36 = vector.load %arg7[%c0_14, %c0_15] : memref<1x1xf32, #tpu.memory_space<vmem>>, vector<1x1xf32>
    %37 = vector.broadcast %36 : vector<1x1xf32> to vector<1x128xf32>
    %38 = arith.addf %35, %37 : vector<1x128xf32>
    %c0_16 = arith.constant 0 : index
    %c0_17 = arith.constant 0 : index
    %39 = vector.load %arg8[%c0_16, %c0_17] : memref<1x128xf32, #tpu.memory_space<vmem>>, vector<1x128xf32>
    tpu.vector_store %arg8[%c0_16, %c0_17], %38 {strides = array<i32>} : memref<1x128xf32, #tpu.memory_space<vmem>>, vector<1x128xf32>,
    return
  }
  func.func @transform_0(%arg0: i32) -> (i32, i32) {
    %c0_i32 = arith.constant 0 : i32
    %c0_i32_0 = arith.constant 0 : i32
    return %c0_i32, %arg0 : i32, i32
  }
  func.func @transform_1(%arg0: i32) -> (i32, i32) {
    %c0_i32 = arith.constant 0 : i32
    %c0_i32_0 = arith.constant 0 : i32
    %c0_i32_1 = arith.constant 0 : i32
    return %c0_i32, %c0_i32_0 : i32, i32
  }
  func.func @transform_2(%arg0: i32) -> (i32, i32) {
    %c0_i32 = arith.constant 0 : i32
    %c0_i32_0 = arith.constant 0 : i32
    %c0_i32_1 = arith.constant 0 : i32
    return %c0_i32, %c0_i32_0 : i32, i32
  }
  func.func @transform_3(%arg0: i32) -> (i32, i32) {
    %c0_i32 = arith.constant 0 : i32
    %c0_i32_0 = arith.constant 0 : i32
    %c0_i32_1 = arith.constant 0 : i32
    return %c0_i32, %c0_i32_0 : i32, i32
  }
  func.func @transform_4(%arg0: i32) -> (i32, i32) {
    %c0_i32 = arith.constant 0 : i32
    %c0_i32_0 = arith.constant 0 : i32
    %c0_i32_1 = arith.constant 0 : i32
    return %c0_i32, %c0_i32_0 : i32, i32
  }
  func.func @transform_5(%arg0: i32) -> (i32, i32) {
    %c0_i32 = arith.constant 0 : i32
    %c0_i32_0 = arith.constant 0 : i32
    %c0_i32_1 = arith.constant 0 : i32
    return %c0_i32, %c0_i32_0 : i32, i32
  }
  func.func @transform_6(%arg0: i32) -> (i32, i32) {
    %c0_i32 = arith.constant 0 : i32
    %c0_i32_0 = arith.constant 0 : i32
    %c0_i32_1 = arith.constant 0 : i32
    return %c0_i32, %c0_i32_0 : i32, i32
  }
  func.func @transform_7(%arg0: i32) -> (i32, i32) {
    %c0_i32 = arith.constant 0 : i32
    %c0_i32_0 = arith.constant 0 : i32
    return %c0_i32, %arg0 : i32, i32
  }
}

</mosaic_0001>

<bundles_post_ra>
// kernel: neuronet_forward_fm.1
= control target key start
LH: loop header
LB: loop body
LE: loop exit
PB: predicated region body
PF: predicated region fallthrough
CT: control target
= control target key end

     0   :  { %s927_s0 = inlined_call_operand.vmem [shape: f32[3,300], index: 0, kind: input, shape index: {}]   ;;  %s928_s1 = inlined_call_operand.vmem [shape: f32[16,3], index: 1, kind: input, shape index: {}]   ;;  %s929_s2 = inlined_call_operand.vmem [shape: f32[16,1], index: 2, kind: input, shape index: {}]   ;;  %s930_s3 = inlined_call_operand.vmem [shape: f32[32,16], index: 3, kind: input, shape index: {}]   ;;  %s931_s4 = inlined_call_operand.vmem [shape: f32[32,1], index: 4, kind: input, shape index: {}]   ;;  %s932_s5 = inlined_call_operand.vmem [shape: f32[32,1], index: 5, kind: input, shape index: {}]   ;;  %s933_s6 = inlined_call_operand.<no memory space> [shape: f32[1,1], index: 6, kind: input, shape index: {}]   ;;  %s934_s7 = inlined_call_operand.hbm [shape: f32[1,300], index: 7, kind: output, shape index: {}]  }
   0x1   :  { %v12_v0 = vstv %s933_s6 }
   0x2   :  { %13 = vst [vmem:[#allocation2] sm:$0x1] %v12_v0 }
   0x3   :  { %14 = vsyncpa [#allocation4], 0 }
   0x4   :  { %16 = vsyncpa [#allocation4 + $0x1], 0  ;;  %s779_s26 = smov 0   ;;  %s781_s27 = smov 0  }
   0x5   :  { %s783_s28 = smov 0   ;;  %s785_s29 = smov 0  }
   0x6 LB: > { %s800_s6 = sadd.s32 4294967295, %s730_s29   ;;  %s589_s30 = sadd.s32 4294967294, %s730_s29   ;;  %s730_s29 = sphi %s785_s29, %s940_s29   ;;  %s726_s28 = sphi %s783_s28, %s939_s28   ;;  %s722_s27 = sphi %s781_s27, %s938_s27   ;;  %s718_s26 = sphi %s779_s26, %s937_s26  }
   0x7   : > { %s804_s8 = sadd.s32 1, %s730_s29   ;;  %s181_s9 = sadd.s32 1, %s726_s28 }
   0x8   : > { %s178_s10 = ssub.s32 %s730_s29, %s804_s8  ;;  %p191_p0 = scmp.ne.s32.totalorder %s726_s28, %s722_s27 }
   0x9   : > { %p179_p1 = scmp.eq.s32.totalorder %s178_s10, 0  ;;  %p192_p2 = scmp.eq.s32.totalorder %s800_s6, 2 }
   0xa   : > { %p197_p3 = scmp.ne.s32.totalorder %s722_s27, %s718_s26  ;;  %p198_p4 = scmp.eq.s32.totalorder %s589_s30, 2 }
   0xb   : > { %s815_s11 = scalar_select %p179_p1, %s726_s28, %s181_s9  }
   0xc   : > { %p817_p5 = por %p192_p2, %p191_p0  ;;  %p821_p6 = por %p198_p4, %p197_p3 }
   0xd   : > { %p592_p7 = scmp.ge.s32.totalorder %s730_s29, 1  ;;  %p241_p8 = scmp.lt.s32.totalorder %s730_s29, 4 }
   0xf   : > { %p242_p9 = pnand %p592_p7, %p241_p8 }
  0x10   : > { %p271_p10 = scmp.lt.s32.totalorder (!%p242_p9), %s800_s6, 2  ;;  %s269_s21 = sand.u32 (!%p242_p9), 1, %s722_s27  }
  0x11   : > { %245 = sbr.rel (%p242_p9) target bundleno = 405 (0x195), region = 48  ;;  %s598_s22 = sshll.u32 (!%p242_p9), %s800_s6, 4 }
  0x12   : > { %s270_s23 = scalar_lea.vmem (!%p242_p9), [#allocation3], %s269_s21 }
  0x13   : > { %s534_s24 = sshll.u32 (!%p242_p9), %s270_s23, 4  ;;  %s535_s24 = int_to_ptr.vmem [resolvable:$true] %s534_s24 }
  0x14   : > { %s670_s14 = scalar_lea.vmem (!%p242_p9), %s535_s24, 16 }
  0x15   : > { %p671_p11 = scmp.ne.s32.totalorder (!%p242_p9), %s535_s24, %s670_s14 }
  0x16   : > { %v279_v1 = vld [vmem:[%s929_s2 + $0x8] sm:$0xff]  ;;  %v732_v3 = vmov 0   ;;  %v276_v4 = vld [vmem:[%s928_s1] sm:$0xff]  ;;  %v733_v5 = vmov 1   ;;  %v734_v7 = vmov 2   ;;  %vm370_vm0 = vcmask 130048  }
  0x17   : > { %v277_v2 = vld [vmem:[%s928_s1 + $0x8] sm:$0xff]  ;;  %664 = vset.pattern.permute.xlu1 %v732_v3  ;;  %663 = vset.pattern.permute.xlu0 %v732_v3  ;;  %v278_v6 = vld [vmem:[%s929_s2] sm:$0xff]  ;;  %v344_v9 = vld [vmem:[%s930_s3 + $0x10] sm:$0xff]  ;;  %s272_s9 = scalar_select %p271_p10, %s800_s6, 2  ;;  %v290_v19 = vlaneseq }
  0x18   : > { %303 = vperm.xlu1 %664, %v279_v1   ;;  %287 = vperm.xlu0 %663, %v277_v2   ;;  %v342_v8 = vld [vmem:[%s930_s3] sm:$0xff]  ;;  %v347_v11 = vld [vmem:[%s931_s4 + $0x8] sm:$0xff]  ;;  %v348_v12 = vld [vmem:[%s931_s4 + $0x10] sm:$0xff]  ;;  %p672_p12 = pnand %p671_p11, %p817_p5  ;;  %s735_s6 = smov [#allocation3]  }
  0x19   : > { %611 = vmatprep.mubr.msk.f32.mxu0 %vm370_vm0, %v342_v8  ;;  %614 = vmatprep.mubr.msk.f32.mxu1 %vm370_vm0, %v344_v9  ;;  %v346_v10 = vld [vmem:[%s931_s4] sm:$0xff]  ;;  %v349_v14 = vld [vmem:[%s931_s4 + $0x18] sm:$0xff]  ;;  %v474_v15 = vld [vmem:[%s932_s5 + $0x10] sm:$0xff]  ;;  %s593_s10 = sshll.u32 %s272_s9, 2  ;;  %v873_v20 = vshrl.u32 %v290_v19, 7  ;;  %s532_s9 = scalar_lea.hbm %s934_s7, %s598_s22 }
  0x1a   : > { %v472_v13 = vld [vmem:[%s932_s5] sm:$0xff]  ;;  %v473_v16 = vld [vmem:[%s932_s5 + $0x8] sm:$0xff]  ;;  %v475_v18 = vld [vmem:[%s932_s5 + $0x18] sm:$0xff]  ;;  %s274_s16 = scalar_lea.vmem %s927_s0, %s593_s10  ;;  %s522_s10 = scalar_lea.sflag [#allocation4], %s269_s21 }
  0x1b   : > { %v509_v17 = vld [vmem:[#allocation2] sm:$0x1]  ;;  %v292_v21 = vsub.s32 0, %v873_v20  ;;  %v318_v25 = vsub.s32 1, %v873_v20  ;;  %v334_v30 = vsub.s32 2, %v873_v20  ;;  %v343_v50 = vld [vmem:[%s930_s3 + $0x8] sm:$0xff]  ;;  %p673_p13 = pneg %p672_p12 }
  0x1c   : > { %665 = vset.pattern.permute.xlu1 %v733_v5  ;;  %282 = vperm.xlu0 %663, %v276_v4   ;;  %v275_v24 = vld [vmem:[%s274_s16] sm:$0x7]  ;;  %v345_v51 = vld [vmem:[%s930_s3 + $0x18] sm:$0xff]  ;;  %s674_s15 = sshll.u32 %s735_s6, 4  ;;  %s675_s15 = int_to_ptr.vmem [resolvable:$false] %s674_s15 }
  0x1d   : > { %313 = vperm.xlu1 %665, %v277_v2   ;;  %v293_v26 = vrot.slane %v275_v24, %v292_v21  ;;  %v319_v29 = vrot.slane %v275_v24, %v318_v25  ;;  %v335_v36 = vrot.slane %v275_v24, %v334_v30  ;;  %s676_s16 = scalar_lea.vmem %s675_s15, 32  ;;  %p677_p0 = scmp.lt.s32.totalorder %s535_s24, %s675_s15 }
  0x1e   : > { %p678_p1 = scmp.lt.s32.totalorder %s676_s16, %s670_s14 }
  0x20   : > { %298 = vperm.xlu0 %663, %v278_v6   ;;  %p679_p2 = por %p678_p1, %p677_p0 }
  0x21   : > { %309 = vperm.xlu1 %665, %v276_v4  }
  0x22   : > { %p680_p3 = pnand %p679_p2, %p673_p13 }
  0x24   : > { %666 = vset.pattern.permute.xlu0 %v734_v7 }
  0x25   : > { %667 = vset.pattern.permute.xlu1 %v734_v7  ;;  %329 = vperm.xlu0 %666, %v277_v2  }
  0x26   : > { %325 = vperm.xlu1 %667, %v276_v4  }
  0x29   : > { %669 = vset.pattern.permute.xlu0 %v732_v3 }
  0x2a   : > { %668 = vset.pattern.permute.xlu1 %v732_v3  ;;  %357 = vperm.xlu0 %669, %v347_v11  }
  0x2b   : > { %352 = vperm.xlu1 %668, %v346_v10  }
  0x2e   : > { %478 = vperm.xlu0 %669, %v472_v13  }
  0x2f   : > { %362 = vperm.xlu1 %668, %v348_v12  }
  0x32   : > { %488 = vperm.xlu0 %669, %v474_v15  }
  0x33   : > { %367 = vperm.xlu1 %668, %v349_v14  }
  0x36   : > { %512 = vperm.xlu0 %669, %v509_v17  }
  0x37   : > { %483 = vperm.xlu1 %668, %v473_v16  }
  0x3b   : > { %493 = vperm.xlu1 %668, %v475_v18  }
  0x93   : > { %v288_v22 = vpop.permute.xlu0 %287  ;;  %v304_v23 = vpop.permute.xlu1 %303 }
  0x94   : > { %v295_v31 = vmul.f32 %v293_v26, %v288_v22 }
  0x96   : > { %v307_v39 = vadd.f32 %v304_v23, %v295_v31 }
  0x97   : > { %v283_v27 = vpop.permute.xlu0 %282 }
  0x98   : > { %v314_v28 = vpop.permute.xlu1 %313  ;;  %v294_v33 = vmul.f32 %v293_v26, %v283_v27 }
  0x99   : > { %v321_v35 = vmul.f32 %v319_v29, %v314_v28 }
  0x9b   : > { %v299_v32 = vpop.permute.xlu0 %298  ;;  %v323_v41 = vadd.f32 %v321_v35, %v307_v39 }
  0x9c   : > { %v310_v34 = vpop.permute.xlu1 %309  ;;  %v306_v37 = vadd.f32 %v299_v32, %v294_v33 }
  0x9d   : > { %v320_v38 = vmul.f32 %v319_v29, %v310_v34 }
  0x9f   : > { %v322_v44 = vadd.f32 %v320_v38, %v306_v37 }
  0xa0   : > { %v330_v40 = vpop.permute.xlu0 %329 }
  0xa1   : > { %v337_v42 = vmul.f32 %v335_v36, %v330_v40  ;;  %v326_v43 = vpop.permute.xlu1 %325 }
  0xa2   : > { %v336_v45 = vmul.f32 %v335_v36, %v326_v43 }
  0xa3   : > { %v339_v46 = vadd.f32 %v337_v42, %v323_v41 }
  0xa4   : > { %v338_v47 = vadd.f32 %v336_v45, %v322_v44 }
  0xa5   : > { %v341_v48 = vmax.f32 %v339_v46, 0.0  ;;  %v358_v54 = vpop.permute.xlu0 %357 }
  0xa6   : > { %v340_v49 = vmax.f32 %v338_v47, 0.0  ;;  %v353_v52 = vpop.permute.xlu1 %352 }
  0xa7   : > { %607 = vmatprep.subr.mxu0 %v341_v48  ;;  %617 = vmatprep.subr.mxu1 %v341_v48 }
  0xa8   : > { %608 = vmatpush3.msra.mxu0 %v341_v48  ;;  %619 = vmatpush3.msra.mxu1 %v341_v48 }
  0xa9   : > { %609 = vmatprep.subr.mxu0 %v340_v49  ;;  %618 = vmatprep.subr.mxu1 %v340_v49  ;;  %v479_v58 = vpop.permute.xlu0 %478 }
  0xaa   : > { %610 = vmatpush3.msra.mxu0 %v340_v49  ;;  %620 = vmatpush3.msra.mxu1 %v340_v49  ;;  %v363_v53 = vpop.permute.xlu1 %362 }
  0xab   : > { %612 = vmatmul.mubr.msk.f32.vlgmr.msra.gmra.mxu0 %vm370_vm0, %v343_v50  ;;  %615 = vmatmul.mubr.msk.f32.vlgmr.msra.gmra.mxu1 %vm370_vm0, %v345_v51 }
  0xad   : > { %v489_v8 = vpop.permute.xlu0 %488 }
  0xae   : > { %v368_v55 = vpop.permute.xlu1 %367 }
  0xb1   : > { %v513_v19 = vpop.permute.xlu0 %512 }
  0xb2   : > { %v484_v2 = vpop.permute.xlu1 %483  ;;  %v518_v23 = vrot.slane %v513_v19, %v292_v21 }
  0xb6   : > { %v494_v11 = vpop.permute.xlu1 %493 }
 0x16b   : > { %v613_v56 = vpop.f32.mrf.mxu0  ;;  %v616_v57 = vpop.f32.mrf.mxu1 }
 0x16c   : > { %v455_v59 = vadd.f32 %v613_v56, %v358_v54  ;;  %v465_v63 = vadd.f32 %v616_v57, %v368_v55 }
 0x16d   : > { %v449_v60 = vpop.f32.mrf.mxu0  ;;  %v459_v61 = vpop.f32.mrf.mxu1 }
 0x16e   : > { %v469_v62 = vmax.f32 %v455_v59, 0.0  ;;  %v450_v0 = vadd.f32 %v449_v60, %v353_v52  ;;  %v460_v1 = vadd.f32 %v459_v61, %v363_v53  ;;  %v471_v6 = vmax.f32 %v465_v63, 0.0 }
 0x170   : > { %v468_v3 = vmax.f32 %v450_v0, 0.0  ;;  %v470_v4 = vmax.f32 %v460_v1, 0.0  ;;  %v497_v5 = vmul.f32 %v484_v2, %v469_v62  ;;  %v499_v12 = vmul.f32 %v494_v11, %v471_v6 }
 0x172   : > { %v496_v7 = vmul.f32 %v479_v58, %v468_v3  ;;  %v498_v10 = vmul.f32 %v489_v8, %v470_v4 }
 0x174   : > { %v500_v9 = vadd.f32 %v497_v5, %v496_v7 }
 0x176   : > { %v501_v13 = vadd.f32 %v500_v9, %v498_v10 }
 0x178   : > { %v502_v14 = vadd.f32 %v501_v13, %v499_v12 }
 0x17a   : > { %v503_v15 = vrot.slane %v502_v14, 4 }
 0x17c   : > { %v504_v16 = vadd.f32 %v503_v15, %v502_v14 }
 0x17e   : > { %v505_v17 = vrot.slane %v504_v16, 2 }
 0x180   : > { %v506_v18 = vadd.f32 %v505_v17, %v504_v16 }
 0x182   : > { %v507_v22 = vrot.slane %v506_v18, 1 }
 0x184   : > { %v508_v24 = vadd.f32 %v507_v22, %v506_v18 }
 0x186   : > { %v519_v25 = vadd.f32 %v518_v23, %v508_v24 }
 0x188   : > { %520 = vst [vmem:[%s270_s23] sm:$0x1] %v519_v25 }
 0x189   : > { %683 = shalt.err (!%p680_p3)
}
 0x18a   : > { %s684_s17 = scalar_lea.hbm %s532_s9, 16  ;;  %s688_s20 = scalar_lea.hbm %s934_s7, 48 }
 0x18b   : > { %p685_p4 = scmp.ne.s32.totalorder %s532_s9, %s684_s17  ;;  %p689_p9 = scmp.lt.s32.totalorder %s532_s9, %s934_s7 }
 0x18c   : > { %p690_p10 = scmp.lt.s32.totalorder %s688_s20, %s684_s17 }
 0x18d   : > { %p686_p7 = pnand %p685_p4, %p817_p5 }
 0x18e   : > { %p691_p11 = por %p690_p10, %p689_p9 }
 0x18f   : > { %p687_p8 = pneg %p686_p7 }
 0x191   : > { %p692_p12 = pnand %p691_p11, %p687_p8 }
 0x193   : > { %695 = shalt.err (!%p692_p12)
}
 0x194   : > { %621 = dma.vmem_to_hbm [thread:$0]  (%p817_p5), %s535_s24, 16, %s532_s9, %s522_s10  }
 0x195 PF: > { %p627_p13 = scmp.ge.s32.totalorder %s730_s29, 2  ;;  %s546_s23 = sand.u32 1, %s718_s26  }
 0x196   : > { %s547_s25 = scalar_lea.sflag [#allocation4], %s546_s23 }
 0x197   : > { %p624_p0 = pnand %p627_p13, %p821_p6 }
 0x199   : > { %p625_p1 = pneg %p624_p0 }
 0x19b   : > { %713 = dma.done.wait (%p625_p1), %s547_s25, 16  }
 0x19c   : > { %715 = vsyncadd (%p625_p1), %s547_s25, 4294967280  ;;  %p19_p2 = scmp.ge.s32.totalorder %s804_s8, 5   ;;  %s937_s26 = smov %s722_s27 }
 0x19d   : > { %s938_s27 = smov %s726_s28  ;;  %s939_s28 = smov %s815_s11 }
 0x19e   : > { %s940_s29 = smov %s804_s8  ;;  %21 = sbr.rel (!%p19_p2) target bundleno = 6 (0x6), region = 83 }
 0x1a3   :  { %551 = vsyncpa [#allocation4], 1 }
 0x1a4   :  { %553 = vsyncpa [#allocation4 + $0x1], 1 }

</bundles_post_ra>
